<compile_context>
chip_gen: v7x
topology: tpu7x:2x2x1
jax: 0.10.0
libtpu: 0.0.40
codegen_flags: <defaults>
</compile_context>

<pallas_src>
import math

import jax
import jax.numpy as jnp
from jax.experimental import pallas as pl
from jax.experimental.pallas import tpu as pltpu


def _log_softmax_last(y):
    m = jnp.max(y, axis=-1, keepdims=True)
    s = y - m
    lse = jnp.log(jnp.sum(jnp.exp(s), axis=-1, keepdims=True))
    return s - lse


def pointer_kernel(w_ref, m1_ref, m2_ref, m3_ref, p1_ref, p2_ref):
    # w_ref : (4, D, 1)  pre-split halves [w1[:D], w1[D:], w2[:D], w2[D:]]
    # m*_ref: (TB, D, N) batch tile, N on lanes / D on sublanes
    # p*_ref: (TB, N)
    m1 = m1_ref[...]
    m2 = m2_ref[...]
    m3 = m3_ref[...]

    w1a = w_ref[0]          # (D, 1)  -- applied to M1 inside X1
    w1b = w_ref[1]          # (D, 1)  -- applied to M2 inside X1
    w2a = w_ref[2]          # (D, 1)  -- applied to M1 inside X2
    w2b = w_ref[3]          # (D, 1)  -- applied to M3 inside X2

    # VPU broadcast-multiply + sublane reduce over D (no 1-row MXU matmuls):
    #   y[b, n] = sum_d w[d] * M[b, d, n]
    y1 = jnp.sum(w1a * m1 + w1b * m2, axis=1)   # (TB, N) f32
    y2 = jnp.sum(w2a * m1 + w2b * m3, axis=1)   # (TB, N) f32

    p1_ref[...] = _log_softmax_last(y1).astype(p1_ref.dtype)
    p2_ref[...] = _log_softmax_last(y2).astype(p2_ref.dtype)


def _choose_tb(B, D, N):
    """Batch-tile size: biggest tile whose double-buffered working set stays
    well inside the smallest per-generation VMEM (v7x: 64 MiB physical)."""
    bytes_per_row = (3 * D * N + 2 * N) * 4          # 3 inputs + 2 outputs, f32
    budget = 40 * 1024 * 1024                        # conservative for v7x
    max_rows = max(1, budget // (2 * bytes_per_row))  # 2x for double buffering
    if B <= max_rows:
        # Whole batch fits in one block.  Split into two steps only when each
        # half is still a large tile, so v7x's two TensorCores both get work
        # without paying per-step overhead on tiny problems.
        half = (B + 1) // 2
        if B >= 16 and half * bytes_per_row >= (2 << 20):
            return max(8, (half // 8) * 8)
        return B
    tb = min(max_rows, B)
    # Multiple of 8 -> sublane-dense output stores and (8,128)-legal blocks.
    return max(8, (tb // 8) * 8)


def _vmem_limit_bytes(tb, D, N):
    buffers = 2 * tb * (3 * D * N + 2 * N) * 4       # double-buffered tiles
    limit = buffers + (8 << 20)                      # headroom (weights, scratch)
    return int(min(max(limit, 32 << 20), 56 << 20))  # stay under v7x's 64 MiB


def pointer_forward(w1, w2, M1, M2, M3):
    """w1, w2: (2D,) ; M1, M2, M3: (B, D, N) float32. Returns (p1, p2): (B, N)."""
    B, D, N = M1.shape

    # Pre-split weight halves on the host (vreg-aligned reads in-kernel; no
    # lane-offset slice at D every grid step), with D laid on sublanes so they
    # broadcast directly against the (TB, D, N) tiles.
    w_pre = jnp.stack([w1[:D], w1[D:], w2[:D], w2[D:]], axis=0)
    w_pre = w_pre.reshape(4, D, 1).astype(jnp.float32)

    tb = _choose_tb(B, D, N)
    grid = (pl.cdiv(B, tb),)

    out_shape = (jax.ShapeDtypeStruct((B, N), jnp.float32),
                 jax.ShapeDtypeStruct((B, N), jnp.float32))

    grid_spec = pltpu.PrefetchScalarGridSpec(
        num_scalar_prefetch=0,
        grid=grid,
        in_specs=[
            pl.BlockSpec((4, D, 1), lambda b: (0, 0, 0)),     # weights
            pl.BlockSpec((tb, D, N), lambda b: (b, 0, 0)),    # M1
            pl.BlockSpec((tb, D, N), lambda b: (b, 0, 0)),    # M2
            pl.BlockSpec((tb, D, N), lambda b: (b, 0, 0)),    # M3
        ],
        out_specs=[
            pl.BlockSpec((tb, N), lambda b: (b, 0)),          # p1
            pl.BlockSpec((tb, N), lambda b: (b, 0)),          # p2
        ],
    )

    return pl.pallas_call(
        pointer_kernel,
        out_shape=out_shape,
        grid_spec=grid_spec,
        compiler_params=pltpu.CompilerParams(
            dimension_semantics=("parallel",),
            vmem_limit_bytes=_vmem_limit_bytes(tb, D, N)),
    )(w_pre, M1, M2, M3)


def pointer_reference(w1, w2, M1, M2, M3):
    X1 = jnp.concatenate([M1, M2], axis=1)   # (B, 2D, N)
    X2 = jnp.concatenate([M1, M3], axis=1)
    Y1 = jnp.einsum("d,bdn->bn", w1, X1)
    Y2 = jnp.einsum("d,bdn->bn", w2, X2)
    return (jax.nn.log_softmax(Y1, axis=1), jax.nn.log_softmax(Y2, axis=1))


if __name__ == "__main__":
    # Small shapes consistent with the forward pass.
    B, D, N = 2, 16, 128

    key = jax.random.PRNGKey(0)
    kw1, kw2, k1, k2, k3 = jax.random.split(key, 5)

    # Deterministic parameter init mirroring nn.init.uniform_(-sqrt(lim), sqrt(lim))
    lim = 3.0 / (2.0 * D)
    bound = math.sqrt(lim)
    w1 = jax.random.uniform(kw1, (2 * D,), jnp.float32, -bound, bound)
    w2 = jax.random.uniform(kw2, (2 * D,), jnp.float32, -bound, bound)

    M1 = jax.random.normal(k1, (B, D, N), jnp.float32)
    M2 = jax.random.normal(k2, (B, D, N), jnp.float32)
    M3 = jax.random.normal(k3, (B, D, N), jnp.float32)

    p1, p2 = pointer_forward(w1, w2, M1, M2, M3)
    jax.block_until_ready((p1, p2))

    r1, r2 = pointer_reference(w1, w2, M1, M2, M3)
    assert p1.shape == (B, N) and p2.shape == (B, N)
    assert jnp.allclose(p1, r1, atol=1e-5, rtol=1e-5)
    assert jnp.allclose(p2, r2, atol=1e-5, rtol=1e-5)

    print("KERNEL_OK")
</pallas_src>

<mosaic_0001>
module attributes {stable_mosaic.version = 11 : i64} {
  func.func @pointer_kernel(%arg0: i32, %arg1: memref<4x16x1xf32, #tpu.memory_space<vmem>>, %arg2: memref<2x16x128xf32, #tpu.memory_space<vmem>>, %arg3: memref<2x16x128xf32, #tpu.memory_space<vmem>>, %arg4: memref<2x16x128xf32, #tpu.memory_space<vmem>>, %arg5: memref<2x128xf32, #tpu.memory_space<vmem>>, %arg6: memref<2x128xf32, #tpu.memory_space<vmem>>) attributes {dimension_semantics = [#tpu.dimension_semantics<parallel>], iteration_bounds = array<i64: 1>, scalar_prefetch = 0 : i64, scratch_operands = 0 : i64, tpu.core_type = #tpu.core_type<tc>, window_params = [{pipeline_mode = #tpu.pipeline_mode<synchronous>, transform_indices = @transform_0, window_bounds = array<i64: 4, 16, 1>}, {transform_indices = @transform_1, window_bounds = array<i64: 2, 16, 128>}, {transform_indices = @transform_2, window_bounds = array<i64: 2, 16, 128>}, {transform_indices = @transform_3, window_bounds = array<i64: 2, 16, 128>}, {transform_indices = @transform_4, window_bounds = array<i64: 2, 128>}, {transform_indices = @transform_5, window_bounds = array<i64: 2, 128>}]} {
    %c0 = arith.constant 0 : index
    %c0_0 = arith.constant 0 : index
    %c0_1 = arith.constant 0 : index
    %0 = vector.load %arg2[%c0, %c0_0, %c0_1] : memref<2x16x128xf32, #tpu.memory_space<vmem>>, vector<2x16x128xf32>
    %c0_2 = arith.constant 0 : index
    %c0_3 = arith.constant 0 : index
    %c0_4 = arith.constant 0 : index
    %1 = vector.load %arg3[%c0_2, %c0_3, %c0_4] : memref<2x16x128xf32, #tpu.memory_space<vmem>>, vector<2x16x128xf32>
    %c0_5 = arith.constant 0 : index
    %c0_6 = arith.constant 0 : index
    %c0_7 = arith.constant 0 : index
    %2 = vector.load %arg4[%c0_5, %c0_6, %c0_7] : memref<2x16x128xf32, #tpu.memory_space<vmem>>, vector<2x16x128xf32>
    %c0_8 = arith.constant 0 : index
    %c0_9 = arith.constant 0 : index
    %c0_10 = arith.constant 0 : index
    %3 = vector.load %arg1[%c0_8, %c0_9, %c0_10] : memref<4x16x1xf32, #tpu.memory_space<vmem>>, vector<1x16x1xf32>
    %4 = vector.shape_cast %3 : vector<1x16x1xf32> to vector<16x1xf32>
    %c1 = arith.constant 1 : index
    %c0_11 = arith.constant 0 : index
    %c0_12 = arith.constant 0 : index
    %5 = vector.load %arg1[%c1, %c0_11, %c0_12] : memref<4x16x1xf32, #tpu.memory_space<vmem>>, vector<1x16x1xf32>
    %6 = vector.shape_cast %5 : vector<1x16x1xf32> to vector<16x1xf32>
    %c2 = arith.constant 2 : index
    %c0_13 = arith.constant 0 : index
    %c0_14 = arith.constant 0 : index
    %7 = vector.load %arg1[%c2, %c0_13, %c0_14] : memref<4x16x1xf32, #tpu.memory_space<vmem>>, vector<1x16x1xf32>
    %8 = vector.shape_cast %7 : vector<1x16x1xf32> to vector<16x1xf32>
    %c3 = arith.constant 3 : index
    %c0_15 = arith.constant 0 : index
    %c0_16 = arith.constant 0 : index
    %9 = vector.load %arg1[%c3, %c0_15, %c0_16] : memref<4x16x1xf32, #tpu.memory_space<vmem>>, vector<1x16x1xf32>
    %10 = vector.shape_cast %9 : vector<1x16x1xf32> to vector<16x1xf32>
    %11 = vector.shape_cast %4 : vector<16x1xf32> to vector<1x16x1xf32>
    %12 = vector.broadcast %11 : vector<1x16x1xf32> to vector<2x16x128xf32>
    %13 = arith.mulf %12, %0 : vector<2x16x128xf32>
    %14 = vector.shape_cast %6 : vector<16x1xf32> to vector<1x16x1xf32>
    %15 = vector.broadcast %14 : vector<1x16x1xf32> to vector<2x16x128xf32>
    %16 = arith.mulf %15, %1 : vector<2x16x128xf32>
    %17 = arith.addf %13, %16 : vector<2x16x128xf32>
    %cst = arith.constant dense<0.000000e+00> : vector<2x128xf32>
    %18 = vector.multi_reduction <add>, %17, %cst [1] : vector<2x16x128xf32> to vector<2x128xf32>
    %19 = vector.shape_cast %8 : vector<16x1xf32> to vector<1x16x1xf32>
    %20 = vector.broadcast %19 : vector<1x16x1xf32> to vector<2x16x128xf32>
    %21 = arith.mulf %20, %0 : vector<2x16x128xf32>
    %22 = vector.shape_cast %10 : vector<16x1xf32> to vector<1x16x1xf32>
    %23 = vector.broadcast %22 : vector<1x16x1xf32> to vector<2x16x128xf32>
    %24 = arith.mulf %23, %2 : vector<2x16x128xf32>
    %25 = arith.addf %21, %24 : vector<2x16x128xf32>
    %cst_17 = arith.constant dense<0.000000e+00> : vector<2x128xf32>
    %26 = vector.multi_reduction <add>, %25, %cst_17 [1] : vector<2x16x128xf32> to vector<2x128xf32>
    %cst_18 = arith.constant dense<0xFF800000> : vector<2xf32>
    %27 = vector.multi_reduction <maximumf>, %18, %cst_18 [1] : vector<2x128xf32> to vector<2xf32>
    %28 = vector.shape_cast %27 : vector<2xf32> to vector<2x1xf32>
    %29 = vector.broadcast %28 : vector<2x1xf32> to vector<2x128xf32>
    %30 = arith.subf %18, %29 : vector<2x128xf32>
    %31 = math.exp %30 : vector<2x128xf32>
    %cst_19 = arith.constant dense<0.000000e+00> : vector<2xf32>
    %32 = vector.multi_reduction <add>, %31, %cst_19 [1] : vector<2x128xf32> to vector<2xf32>
    %33 = vector.shape_cast %32 : vector<2xf32> to vector<2x1xf32>
    %34 = math.log %33 : vector<2x1xf32>
    %35 = vector.broadcast %34 : vector<2x1xf32> to vector<2x128xf32>
    %36 = arith.subf %30, %35 : vector<2x128xf32>
    %c0_20 = arith.constant 0 : index
    %c0_21 = arith.constant 0 : index
    %37 = vector.load %arg5[%c0_20, %c0_21] : memref<2x128xf32, #tpu.memory_space<vmem>>, vector<2x128xf32>
    tpu.vector_store %arg5[%c0_20, %c0_21], %36 {strides = array<i32>} : memref<2x128xf32, #tpu.memory_space<vmem>>, vector<2x128xf32>,
    %cst_22 = arith.constant dense<0xFF800000> : vector<2xf32>
    %38 = vector.multi_reduction <maximumf>, %26, %cst_22 [1] : vector<2x128xf32> to vector<2xf32>
    %39 = vector.shape_cast %38 : vector<2xf32> to vector<2x1xf32>
    %40 = vector.broadcast %39 : vector<2x1xf32> to vector<2x128xf32>
    %41 = arith.subf %26, %40 : vector<2x128xf32>
    %42 = math.exp %41 : vector<2x128xf32>
    %cst_23 = arith.constant dense<0.000000e+00> : vector<2xf32>
    %43 = vector.multi_reduction <add>, %42, %cst_23 [1] : vector<2x128xf32> to vector<2xf32>
    %44 = vector.shape_cast %43 : vector<2xf32> to vector<2x1xf32>
    %45 = math.log %44 : vector<2x1xf32>
    %46 = vector.broadcast %45 : vector<2x1xf32> to vector<2x128xf32>
    %47 = arith.subf %41, %46 : vector<2x128xf32>
    %c0_24 = arith.constant 0 : index
    %c0_25 = arith.constant 0 : index
    %48 = vector.load %arg6[%c0_24, %c0_25] : memref<2x128xf32, #tpu.memory_space<vmem>>, vector<2x128xf32>
    tpu.vector_store %arg6[%c0_24, %c0_25], %47 {strides = array<i32>} : memref<2x128xf32, #tpu.memory_space<vmem>>, vector<2x128xf32>,
    return
  }
  func.func @transform_0(%arg0: i32) -> (i32, i32, i32) {
    %c0_i32 = arith.constant 0 : i32
    %c0_i32_0 = arith.constant 0 : i32
    %c0_i32_1 = arith.constant 0 : i32
    %c0_i32_2 = arith.constant 0 : i32
    return %c0_i32, %c0_i32_0, %c0_i32_1 : i32, i32, i32
  }
  func.func @transform_1(%arg0: i32) -> (i32, i32, i32) {
    %c0_i32 = arith.constant 0 : i32
    %c0_i32_0 = arith.constant 0 : i32
    %c0_i32_1 = arith.constant 0 : i32
    return %arg0, %c0_i32, %c0_i32_0 : i32, i32, i32
  }
  func.func @transform_2(%arg0: i32) -> (i32, i32, i32) {
    %c0_i32 = arith.constant 0 : i32
    %c0_i32_0 = arith.constant 0 : i32
    %c0_i32_1 = arith.constant 0 : i32
    return %arg0, %c0_i32, %c0_i32_0 : i32, i32, i32
  }
  func.func @transform_3(%arg0: i32) -> (i32, i32, i32) {
    %c0_i32 = arith.constant 0 : i32
    %c0_i32_0 = arith.constant 0 : i32
    %c0_i32_1 = arith.constant 0 : i32
    return %arg0, %c0_i32, %c0_i32_0 : i32, i32, i32
  }
  func.func @transform_4(%arg0: i32) -> (i32, i32) {
    %c0_i32 = arith.constant 0 : i32
    %c0_i32_0 = arith.constant 0 : i32
    return %arg0, %c0_i32 : i32, i32
  }
  func.func @transform_5(%arg0: i32) -> (i32, i32) {
    %c0_i32 = arith.constant 0 : i32
    %c0_i32_0 = arith.constant 0 : i32
    return %arg0, %c0_i32 : i32, i32
  }
}

</mosaic_0001>

<bundles_post_ra>
// kernel: tpu_custom_call.1
= control target key start
LH: loop header
LB: loop body
LE: loop exit
PB: predicated region body
PF: predicated region fallthrough
CT: control target
= control target key end

     0   :  { %11 = vsyncpa [#allocation3], 0  ;;  %s487_s0 = inlined_call_operand.vmem [shape: f32[4,16,1], index: 0, kind: input, shape index: {}]   ;;  %s488_s1 = inlined_call_operand.vmem [shape: f32[2,16,128], index: 1, kind: input, shape index: {}]   ;;  %s489_s2 = inlined_call_operand.vmem [shape: f32[2,16,128], index: 2, kind: input, shape index: {}]   ;;  %s490_s3 = inlined_call_operand.hbm [shape: f32[2,16,128], index: 3, kind: input, shape index: {}]   ;;  %s491_s4 = inlined_call_operand.hbm [shape: f32[2,128], index: 4, kind: output, shape index: {0}]   ;;  %s492_s5 = inlined_call_operand.hbm [shape: f32[2,128], index: 5, kind: output, shape index: {1}]  }
   0x1   :  { %12 = vsyncpa [#allocation4], 0 }
   0x2   :  { %13 = vsyncpa [#allocation7], 0  ;;  %s357_s18 = smov [#allocation2]   ;;  %s285_s22 = scalar_lea.hbm %s490_s3, 512 }
   0x3   :  { %s25_s19 = sshll.u32 %s357_s18, 4  ;;  %p286_p0 = scmp.ne.s32.totalorder %s490_s3, %s285_s22  ;;  %s26_s19 = int_to_ptr.vmem [resolvable:$true] %s25_s19 }
   0x4   :  { %p289_p1 = scmp.lt.u32.totalorder %s285_s22, %s490_s3 }
   0x6   :  { %p291_p2 = pnand %p289_p1, %p286_p0 }
   0x8   :  { %294 = shalt.err (!%p291_p2)
}
   0x9   :  { %s295_s27 = scalar_lea.vmem %s26_s19, 512  ;;  %p300_p4 = scmp.lt.s32.totalorder %s26_s19, %s26_s19 }
   0xa   :  { %p296_p3 = scmp.ne.s32.totalorder %s26_s19, %s295_s27  ;;  %p301_p5 = scmp.lt.s32.totalorder %s295_s27, %s295_s27 }
   0xc   :  { %p302_p6 = por %p301_p5, %p300_p4 }
   0xe   :  { %p303_p7 = pnand %p302_p6, %p296_p3 }
  0x10   :  { %306 = shalt.err (!%p303_p7)
}
  0x11   :  { %s358_s28 = smov 128   ;;  %s359_s29 = smov 8  }
  0x12   :  { %31 = dma.hbm_to_vmem [thread:$0]  %s490_s3, 512, %s26_s19, [#allocation3], %s358_s28, %s358_s28, %s359_s29  }
  0x13   :  { %351 = dma.done.wait [#allocation3], 512  }
  0x14   :  { %352 = vsyncadd [#allocation3], 4294966784  ;;  %v360_v0 = vmov 0   ;;  %v259_v1 = vld [vmem:[%s487_s0 + $0x10] sm:$0xff]  ;;  %v47_v2 = vld [vmem:[%s487_s0] sm:$0xff]  ;;  %vm152_vm0 = vcmask 1041409  }
  0x15   :  { %272 = vset.pattern.permute.xlu1 %v360_v0  ;;  %271 = vset.pattern.permute.xlu0 %v360_v0  ;;  %v260_v3 = vld [vmem:[%s487_s0 + $0x18] sm:$0xff]  ;;  %v48_v4 = vld [vmem:[%s487_s0 + $0x8] sm:$0xff]  ;;  %v261_v6 = vld [vmem:[%s487_s0 + $0x20] sm:$0xff]  ;;  %vm155_vm1 = vcmask 1041408  }
  0x16   :  { %74 = vperm.xlu1 %272, %v259_v1   ;;  %60 = vperm.xlu0 %271, %v47_v2   ;;  %v262_v5 = vld [vmem:[%s487_s0 + $0x28] sm:$0xff]  ;;  %v264_v7 = vld [vmem:[%s487_s0 + $0x38] sm:$0xff]  ;;  %v263_v8 = vld [vmem:[%s487_s0 + $0x30] sm:$0xff] }
  0x17   :  { %v39_v9 = vld [vmem:[%s489_s2] sm:$0xff]  ;;  %v41_v11 = vld [vmem:[%s489_s2 + $0x10] sm:$0xff]  ;;  %v40_v15 = vld [vmem:[%s489_s2 + $0x8] sm:$0xff] }
  0x18   :  { %v35_v13 = vld [vmem:[%s488_s1] sm:$0xff]  ;;  %v37_v14 = vld [vmem:[%s488_s1 + $0x10] sm:$0xff]  ;;  %v42_v16 = vld [vmem:[%s489_s2 + $0x18] sm:$0xff] }
  0x19   :  { %v36_v17 = vld [vmem:[%s488_s1 + $0x8] sm:$0xff]  ;;  %v38_v18 = vld [vmem:[%s488_s1 + $0x18] sm:$0xff]  ;;  %v43_v41 = vld [vmem:[#allocation2] sm:$0xff]  ;;  %s361_s1 = smov [#allocation5]  }
  0x1a   :  { %79 = vperm.xlu1 %272, %v260_v3   ;;  %65 = vperm.xlu0 %271, %v48_v4   ;;  %v44_v37 = vld [vmem:[#allocation2 + $0x8] sm:$0xff]  ;;  %v46_v38 = vld [vmem:[#allocation2 + $0x18] sm:$0xff]  ;;  %v45_v42 = vld [vmem:[#allocation2 + $0x10] sm:$0xff]  ;;  %s236_s2 = sshll.u32 %s361_s1, 4  ;;  %s237_s2 = int_to_ptr.vmem [resolvable:$true] %s236_s2 }
  0x1b   :  { %s307_s12 = scalar_lea.vmem %s237_s2, 32  ;;  %p312_p9 = scmp.lt.s32.totalorder %s237_s2, %s237_s2 }
  0x1c   :  { %p308_p8 = scmp.ne.s32.totalorder %s237_s2, %s307_s12  ;;  %p313_p10 = scmp.lt.s32.totalorder %s307_s12, %s307_s12 }
  0x1e   :  { %111 = vperm.xlu1 %272, %v262_v5   ;;  %106 = vperm.xlu0 %271, %v261_v6   ;;  %p314_p11 = por %p313_p10, %p312_p9 }
  0x20   :  { %p315_p12 = pnand %p314_p11, %p308_p8 }
  0x22   :  { %125 = vperm.xlu1 %272, %v264_v7   ;;  %120 = vperm.xlu0 %271, %v263_v8  }
  0x95   :  { %v75_v10 = vpop.permute.xlu1 %74  ;;  %v61_v12 = vpop.permute.xlu0 %60 }
  0x96   :  { %v82_v19 = vmul.f32 %v75_v10, %v39_v9  ;;  %v84_v20 = vmul.f32 %v75_v10, %v41_v11  ;;  %v68_v21 = vmul.f32 %v61_v12, %v35_v13  ;;  %v70_v22 = vmul.f32 %v61_v12, %v37_v14 }
  0x98   :  { %v86_v29 = vadd.f32 %v82_v19, %v68_v21  ;;  %v88_v30 = vadd.f32 %v84_v20, %v70_v22 }
  0x99   :  { %v80_v23 = vpop.permute.xlu1 %79  ;;  %v66_v24 = vpop.permute.xlu0 %65 }
  0x9a   :  { %v83_v25 = vmul.f32 %v80_v23, %v40_v15  ;;  %v85_v26 = vmul.f32 %v80_v23, %v42_v16  ;;  %v69_v27 = vmul.f32 %v66_v24, %v36_v17  ;;  %v71_v28 = vmul.f32 %v66_v24, %v38_v18 }
  0x9c   :  { %v87_v31 = vadd.f32 %v83_v25, %v69_v27  ;;  %v89_v32 = vadd.f32 %v85_v26, %v71_v28 }
  0x9d   :  { %v112_v33 = vpop.permute.xlu1 %111  ;;  %v107_v34 = vpop.permute.xlu0 %106 }
  0x9e   :  { %v90_v35 = vadd.f32 %v87_v31, %v86_v29  ;;  %v97_v36 = vadd.f32 %v89_v32, %v88_v30  ;;  %v115_v43 = vmul.f32 %v112_v33, %v36_v17  ;;  %v117_v44 = vmul.f32 %v112_v33, %v38_v18 }
  0x9f   :  { %v114_v51 = vmul.f32 %v107_v34, %v35_v13  ;;  %v116_v52 = vmul.f32 %v107_v34, %v37_v14 }
  0xa0   :  { %v91_v39 = vrot.slane %v90_v35, 4  ;;  %v98_v40 = vrot.slane %v97_v36, 4 }
  0xa1   :  { %v126_v45 = vpop.permute.xlu1 %125  ;;  %v121_v46 = vpop.permute.xlu0 %120 }
  0xa2   :  { %v92_v47 = vadd.f32 %v91_v39, %v90_v35  ;;  %v99_v48 = vadd.f32 %v98_v40, %v97_v36  ;;  %v129_v49 = vmul.f32 %v126_v45, %v44_v37  ;;  %v131_v50 = vmul.f32 %v126_v45, %v46_v38 }
  0xa3   :  { %v128_v53 = vmul.f32 %v121_v46, %v43_v41  ;;  %v130_v54 = vmul.f32 %v121_v46, %v45_v42 }
  0xa4   :  { %v93_v55 = vrot.slane %v92_v47, 2  ;;  %v100_v56 = vrot.slane %v99_v48, 2  ;;  %v133_v57 = vadd.f32 %v129_v49, %v115_v43  ;;  %v135_v58 = vadd.f32 %v131_v50, %v117_v44 }
  0xa5   :  { %v132_v59 = vadd.f32 %v128_v53, %v114_v51  ;;  %v134_v60 = vadd.f32 %v130_v54, %v116_v52 }
  0xa6   :  { %v94_v61 = vadd.f32 %v93_v55, %v92_v47  ;;  %v101_v62 = vadd.f32 %v100_v56, %v99_v48 }
  0xa7   :  { %v136_v63 = vadd.f32 %v133_v57, %v132_v59  ;;  %v143_v0 = vadd.f32 %v135_v58, %v134_v60 }
  0xa8   :  { %v95_v1 = vrot.slane %v94_v61, 1  ;;  %v102_v2 = vrot.slane %v101_v62, 1 }
  0xa9   :  { %v137_v3 = vrot.slane %v136_v63, 4  ;;  %v144_v4 = vrot.slane %v143_v0, 4 }
  0xaa   :  { %v96_v5 = vadd.f32 %v95_v1, %v94_v61  ;;  %v103_v6 = vadd.f32 %v102_v2, %v101_v62 }
  0xab   :  { %v138_v7 = vadd.f32 %v137_v3, %v136_v63  ;;  %v145_v8 = vadd.f32 %v144_v4, %v143_v0 }
  0xac   :  { %v153_v9 = vsel %vm152_vm0, %v103_v6, %v96_v5 }
  0xad   :  { %v139_v10 = vrot.slane %v138_v7, 2  ;;  %v146_v11 = vrot.slane %v145_v8, 2  ;;  %v156_v12 = vsel %vm155_vm1, %v153_v9, -inf }
  0xae   :  { %157 = vmax.xlane.f32.xlu0 %v156_v12 }
  0xaf   :  { %v140_v13 = vadd.f32 %v139_v10, %v138_v7  ;;  %v147_v14 = vadd.f32 %v146_v11, %v145_v8 }
  0xb1   :  { %v141_v15 = vrot.slane %v140_v13, 1  ;;  %v148_v16 = vrot.slane %v147_v14, 1 }
  0xb3   :  { %v142_v17 = vadd.f32 %v141_v15, %v140_v13  ;;  %v149_v18 = vadd.f32 %v148_v16, %v147_v14 }
  0xb5   :  { %v193_v19 = vsel %vm152_vm0, %v149_v18, %v142_v17 }
  0xb6   :  { %v195_v20 = vsel %vm155_vm1, %v193_v19, -inf }
  0xb7   :  { %196 = vmax.xlane.f32.xlu1 %v195_v20 }
 0x13b   :  { %v158_v21 = vpop.xlane.xlu0 %157 }
 0x13c   :  { %v160_v22 = vrot.slane %v158_v21, 1  ;;  %v163_v23 = vsub.f32 %v96_v5, %v158_v21 }
 0x13e   :  { %v164_v24 = vsub.f32 %v103_v6, %v160_v22  ;;  %v165_v25 = vmul.f32 1.442695, %v163_v23 }
 0x140   :  { %v167_v26 = vmul.f32 1.442695, %v164_v24 }
 0x142   :  { %273 = vpow2.f32 %v167_v26 }
 0x143   :  { %275 = vpow2.f32 %v165_v25 }
 0x144   :  { %v197_v27 = vpop.xlane.xlu1 %196 }
 0x145   :  { %v199_v28 = vrot.slane %v197_v27, 1  ;;  %v202_v29 = vsub.f32 %v142_v17, %v197_v27 }
 0x147   :  { %v203_v30 = vsub.f32 %v149_v18, %v199_v28  ;;  %v204_v31 = vmul.f32 1.442695, %v202_v29 }
 0x149   :  { %v206_v32 = vmul.f32 1.442695, %v203_v30 }
 0x14b   :  { %277 = vpow2.f32 %v206_v32 }
 0x14c   :  { %v274_v33 = vpop.eup %273  ;;  %279 = vpow2.f32 %v204_v31 }
 0x14d   :  { %v171_v34 = vrot.slane %v274_v33, 7  ;;  %v276_v35 = vpop.eup %275 }
 0x14f   :  { %v172_v36 = vsel %vm152_vm0, %v171_v34, %v276_v35 }
 0x150   :  { %v174_v37 = vsel %vm155_vm1, %v172_v36, 0.0 }
 0x151   :  { %175 = vadd.xlane.f32.xlu0 %v174_v37 }
 0x155   :  { %v278_v38 = vpop.eup %277 }
 0x156   :  { %v210_v39 = vrot.slane %v278_v38, 7  ;;  %v280_v40 = vpop.eup %279 }
 0x158   :  { %v211_v41 = vsel %vm152_vm0, %v210_v39, %v280_v40 }
 0x159   :  { %v213_v42 = vsel %vm155_vm1, %v211_v41, 0.0 }
 0x15a   :  { %214 = vadd.xlane.f32.xlu0 %v213_v42 }
 0x1de   :  { %v176_v43 = vpop.xlane.xlu0 %175 }
 0x1df   :  { %281 = vlog2.f32 %v176_v43 }
 0x1e7   :  { %v215_v44 = vpop.xlane.xlu0 %214 }
 0x1e8   :  { %283 = vlog2.f32 %v215_v44 }
 0x1e9   :  { %v282_v45 = vpop.eup %281 }
 0x1ea   :  { %v178_v46 = vmul.f32 0.6931472, %v282_v45 }
 0x1ec   :  { %v180_v47 = vrot.slane %v178_v46, 1  ;;  %v183_v49 = vsub.f32 %v163_v23, %v178_v46 }
 0x1ee   :  { %v184_v48 = vsub.f32 %v164_v24, %v180_v47 }
 0x1f0   :  { %v187_v50 = vrot.slane %v184_v48, 7 }
 0x1f2   :  { %v284_v51 = vpop.eup %283  ;;  %v188_v52 = vsel %vm152_vm0, %v187_v50, %v183_v49 }
 0x1f3   :  { %v217_v53 = vmul.f32 0.6931472, %v284_v51  ;;  %190 = vst [vmem:[#allocation5] sm:$0x3] %v188_v52 }
 0x1f4   :  { %318 = shalt.err (!%p315_p12)
}
 0x1f5   :  { %s319_s14 = scalar_lea.hbm %s491_s4, 32 }
 0x1f6   :  { %p320_p13 = scmp.ne.s32.totalorder %s491_s4, %s319_s14  ;;  %p323_p0 = scmp.lt.u32.totalorder %s319_s14, %s491_s4 }
 0x1f8   :  { %p325_p1 = pnand %p323_p0, %p320_p13 }
 0x1fa   :  { %328 = shalt.err (!%p325_p1)
}
 0x1fb   :  { %239 = dma.vmem_to_hbm [thread:$0]  %s237_s2, 32, %s491_s4, [#allocation4]   ;;  %v219_v54 = vrot.slane %v217_v53, 1  ;;  %v222_v56 = vsub.f32 %v202_v29, %v217_v53 }
 0x1fc   :  { %s362_s21 = smov [#allocation6]  }
 0x1fd   :  { %v223_v55 = vsub.f32 %v203_v30, %v219_v54  ;;  %s246_s22 = sshll.u32 %s362_s21, 4  ;;  %s247_s22 = int_to_ptr.vmem [resolvable:$true] %s246_s22 }
 0x1fe   :  { %s329_s23 = scalar_lea.vmem %s247_s22, 32  ;;  %p334_p3 = scmp.lt.s32.totalorder %s247_s22, %s247_s22 }
 0x1ff   :  { %v226_v57 = vrot.slane %v223_v55, 7  ;;  %p330_p2 = scmp.ne.s32.totalorder %s247_s22, %s329_s23  ;;  %p335_p4 = scmp.lt.s32.totalorder %s329_s23, %s329_s23 }
 0x201   :  { %v227_v58 = vsel %vm152_vm0, %v226_v57, %v222_v56  ;;  %p336_p5 = por %p335_p4, %p334_p3 }
 0x202   :  { %229 = vst [vmem:[#allocation6] sm:$0x3] %v227_v58 }
 0x203   :  { %p337_p6 = pnand %p336_p5, %p330_p2 }
 0x205   :  { %340 = shalt.err (!%p337_p6)
}
 0x206   :  { %s341_s4 = scalar_lea.hbm %s492_s5, 32 }
 0x207   :  { %p342_p7 = scmp.ne.s32.totalorder %s492_s5, %s341_s4  ;;  %p345_p8 = scmp.lt.u32.totalorder %s341_s4, %s492_s5 }
 0x209   :  { %p347_p9 = pnand %p345_p8, %p342_p7 }
 0x20b   :  { %350 = shalt.err (!%p347_p9)
}
 0x20c   :  { %249 = dma.vmem_to_hbm [thread:$0]  %s247_s22, 32, %s492_s5, [#allocation7]  }
 0x20d   :  { %353 = dma.done.wait [#allocation4], 32  }
 0x20e   :  { %354 = vsyncadd [#allocation4], 4294967264 }
 0x20f   :  { %355 = dma.done.wait [#allocation7], 32  }
 0x210   :  { %356 = vsyncadd [#allocation7], 4294967264 }
 0x211   :  { %256 = vsyncpa [#allocation3], 1 }
 0x212   :  { %257 = vsyncpa [#allocation4], 1 }
 0x213   :  { %258 = vsyncpa [#allocation7], 1 }

</bundles_post_ra>
